<compile_context>
chip_gen: v7x
topology: tpu7x:2x2x1
jax: 0.10.0
libtpu: 0.0.40
codegen_flags: <defaults>
</compile_context>

<pallas_src>
import math
import functools

import jax
import jax.numpy as jnp
from jax.experimental import pallas as pl
from jax.experimental.pallas import tpu as pltpu


# ---------------- ArcFace hyper-parameters (ShopeeNet defaults) ----------------
S = 30.0
MARGIN = 0.5
LS_EPS = 0.0          # default ls_eps=0.0 -> label-smoothing branch is skipped
COS_M = math.cos(MARGIN)
SIN_M = math.sin(MARGIN)
TH = math.cos(math.pi - MARGIN)
MM = math.sin(math.pi - MARGIN) * MARGIN
NORM_EPS = 1e-12      # F.normalize default eps


# --------------------------------- kernels -----------------------------------
def _pool_normalize_kernel(x_ref, fn_ref):
    """AdaptiveAvgPool2d(1) + F.normalize for one batch tile.

    x_ref:  (TILE_B, HW, C) f32  -- C on the lane axis, HW reduce is over sublanes
    fn_ref: (TILE_B, C)     bf16 -- normalized pooled features (matmul operand)
    """
    x = x_ref[...].astype(jnp.float32)
    feat = jnp.mean(x, axis=1)                                      # (TILE_B, C)
    ssq = jnp.sum(feat * feat, axis=-1, keepdims=True)
    inv = jax.lax.rsqrt(jnp.maximum(ssq, NORM_EPS * NORM_EPS))      # EUP rsqrt
    fn_ref[...] = (feat * inv).astype(fn_ref.dtype)


def _weight_normalize_kernel(w_ref, wn_ref):
    """F.normalize(self.weight) for one class tile (hoisted out of the inner loop).

    w_ref:  (TILE_N, C) f32 ; wn_ref: (TILE_N, C) bf16
    """
    w = w_ref[...].astype(jnp.float32)
    ssq = jnp.sum(w * w, axis=-1, keepdims=True)
    inv = jax.lax.rsqrt(jnp.maximum(ssq, NORM_EPS * NORM_EPS))
    wn_ref[...] = (w * inv).astype(wn_ref.dtype)


def _arcface_kernel(fn_ref, wn_ref, label_ref, o_ref, *, n_classes):
    """ArcMarginProduct logits for one (batch tile, class tile) grid point.

    fn_ref:    (TILE_B, C)      bf16 normalized features (resident across j)
    wn_ref:    (TILE_N, C)      bf16 normalized weight tile (streamed over j)
    label_ref: (TILE_B, 1)      int32 labels
    o_ref:     (TILE_B, TILE_N) f32 scaled logits
    """
    j = pl.program_id(1)
    tb, tn = o_ref.shape

    # cosine = F.linear(F.normalize(input), F.normalize(weight))  (MXU, f32 acc)
    cosine = jax.lax.dot_general(
        fn_ref[...], wn_ref[...], (((1,), (1,)), ((), ())),
        preferred_element_type=jnp.float32)                         # (tb, tn)

    # sine = sqrt(1 - cosine^2), clamped to avoid NaN from float error
    sine = jnp.sqrt(jnp.maximum(1.0 - cosine * cosine, 0.0))
    phi = cosine * COS_M - sine * SIN_M
    phi = jnp.where(cosine > TH, phi, cosine - MM)                  # easy_margin=False

    # one-hot over the *global* class index covered by this tile
    col = jax.lax.broadcasted_iota(jnp.int32, (tb, tn), 1) + j * tn
    one_hot = (col == label_ref[...]).astype(jnp.float32)
    if LS_EPS > 0.0:
        one_hot = (1.0 - LS_EPS) * one_hot + LS_EPS / n_classes

    o_ref[...] = ((one_hot * phi + (1.0 - one_hot) * cosine) * S).astype(o_ref.dtype)


# --------------------------------- wrapper ------------------------------------
def _ceil_to(x, m):
    return ((x + m - 1) // m) * m


@functools.partial(jax.jit, static_argnames=("tile_n", "tile_b"))
def shopee_net_forward(feat_map, weight, label, *, tile_n=1024, tile_b=128):
    """feat_map: (B, C, H, W) f32 backbone output; weight: (N, C) f32; label: (B,)."""
    B, C, H, W = feat_map.shape
    N = weight.shape[0]
    HW = H * W

    # --- batch tiling ---------------------------------------------------------
    if B <= tile_b:
        TILE_B, Bp = B, B                      # single batch tile (block == full dim)
    else:
        TILE_B = tile_b                        # multiple of 8
        Bp = _ceil_to(B, TILE_B)

    # --- class tiling: largest 128-multiple <= tile_n that divides padded N ----
    Np = _ceil_to(N, 128)
    cap = max(128, (min(tile_n, Np) // 128) * 128)
    TILE_N = 128
    for cand in range(cap, 127, -128):
        if Np % cand == 0:
            TILE_N = cand
            break

    # NCHW -> (B, HW, C): channels on the 128-lane axis (lane-dense loads,
    # pooling becomes a sublane reduction).  Layout plumbing done in the wrapper.
    x = jnp.transpose(feat_map.reshape(B, C, HW), (0, 2, 1))
    lab = label.reshape(B, 1).astype(jnp.int32)
    w = weight
    if Bp != B:
        x = jnp.pad(x, ((0, Bp - B), (0, 0), (0, 0)))
        lab = jnp.pad(lab, ((0, Bp - B), (0, 0)))
    if Np != N:
        w = jnp.pad(w, ((0, Np - N), (0, 0)))

    # 1) pooling + feature normalization -> bf16
    fn = pl.pallas_call(
        _pool_normalize_kernel,
        out_shape=jax.ShapeDtypeStruct((Bp, C), jnp.bfloat16),
        grid=(Bp // TILE_B,),
        in_specs=[pl.BlockSpec((TILE_B, HW, C), lambda i: (i, 0, 0))],
        out_specs=pl.BlockSpec((TILE_B, C), lambda i: (i, 0)),
        compiler_params=pltpu.CompilerParams(dimension_semantics=("parallel",)),
    )(x)

    # 2) weight normalization -> bf16 (once per forward, tiled over classes)
    wn = pl.pallas_call(
        _weight_normalize_kernel,
        out_shape=jax.ShapeDtypeStruct((Np, C), jnp.bfloat16),
        grid=(Np // TILE_N,),
        in_specs=[pl.BlockSpec((TILE_N, C), lambda j: (j, 0))],
        out_specs=pl.BlockSpec((TILE_N, C), lambda j: (j, 0)),
        compiler_params=pltpu.CompilerParams(dimension_semantics=("parallel",)),
    )(w)

    # 3) ArcFace logits: 2-D grid; weight tiles streamed along the inner N axis,
    #    fn/label tiles resident across it, lane-dense (TILE_B, TILE_N) output.
    logits = pl.pallas_call(
        functools.partial(_arcface_kernel, n_classes=N),
        out_shape=jax.ShapeDtypeStruct((Bp, Np), jnp.float32),
        grid=(Bp // TILE_B, Np // TILE_N),
        in_specs=[
            pl.BlockSpec((TILE_B, C), lambda i, j: (i, 0)),
            pl.BlockSpec((TILE_N, C), lambda i, j: (j, 0)),
            pl.BlockSpec((TILE_B, 1), lambda i, j: (i, 0)),
        ],
        out_specs=pl.BlockSpec((TILE_B, TILE_N), lambda i, j: (i, j)),
        compiler_params=pltpu.CompilerParams(
            dimension_semantics=("parallel", "parallel")),
    )(fn, wn, lab)

    return logits[:B, :N]


# -------------------------------- reference -----------------------------------
def reference_forward(feat_map, weight, label):
    """Pure-JAX reference mirroring the PyTorch forward (with the same bf16 cast
    on the normalized matmul operands that the kernel uses)."""
    feat = jnp.mean(feat_map, axis=(2, 3))                          # AdaptiveAvgPool2d(1)
    fn = feat * jax.lax.rsqrt(
        jnp.maximum(jnp.sum(feat * feat, -1, keepdims=True), NORM_EPS * NORM_EPS))
    wn = weight * jax.lax.rsqrt(
        jnp.maximum(jnp.sum(weight * weight, -1, keepdims=True), NORM_EPS * NORM_EPS))
    cosine = jnp.dot(fn.astype(jnp.bfloat16), wn.astype(jnp.bfloat16).T,
                     preferred_element_type=jnp.float32)
    sine = jnp.sqrt(jnp.maximum(1.0 - cosine ** 2, 0.0))
    phi = cosine * COS_M - sine * SIN_M
    phi = jnp.where(cosine > TH, phi, cosine - MM)
    one_hot = jax.nn.one_hot(label, weight.shape[0], dtype=jnp.float32)
    if LS_EPS > 0.0:
        one_hot = (1.0 - LS_EPS) * one_hot + LS_EPS / weight.shape[0]
    return (one_hot * phi + (1.0 - one_hot) * cosine) * S


if __name__ == "__main__":
    # Small stand-in for the efficientnet_b0 backbone output:
    # batch=8, channels=128, spatial 7x7, 384 classes (-> 3 class tiles of 128).
    B, C, H, W = 8, 128, 7, 7
    N_CLASSES = 384

    key = jax.random.PRNGKey(0)
    k_x, k_w, k_l = jax.random.split(key, 3)

    feat_map = jax.random.normal(k_x, (B, C, H, W), dtype=jnp.float32)

    # ArcMarginProduct weight: xavier_uniform_ on (out_features, in_features).
    bound = math.sqrt(6.0 / (C + N_CLASSES))
    weight = jax.random.uniform(
        k_w, (N_CLASSES, C), minval=-bound, maxval=bound, dtype=jnp.float32)

    label = jax.random.randint(k_l, (B,), 0, N_CLASSES, dtype=jnp.int32)

    # tile_n=128 exercises the multi-tile class grid at toy shapes;
    # the production default is tile_n=1024 (~2.5 MB bf16 weight tiles at C=1280,
    # well under default scoped VMEM on v5e/v6e/v7x when double-buffered).
    out = shopee_net_forward(feat_map, weight, label, tile_n=128)
    out = jax.block_until_ready(out)

    ref = reference_forward(feat_map, weight, label)
    assert out.shape == (B, N_CLASSES)
    assert jnp.allclose(out, ref, atol=5e-2, rtol=5e-2), (
        "mismatch vs reference: max abs diff = "
        f"{float(jnp.max(jnp.abs(out - ref)))}")

    print("KERNEL_OK")
</pallas_src>

<mosaic_0001>
module attributes {stable_mosaic.version = 11 : i64} {
  func.func @_weight_normalize_kernel(%arg0: i32, %arg1: memref<128x128xf32, #tpu.memory_space<vmem>>, %arg2: memref<128x128xbf16, #tpu.memory_space<vmem>>) attributes {dimension_semantics = [#tpu.dimension_semantics<parallel>], iteration_bounds = array<i64: 3>, scalar_prefetch = 0 : i64, scratch_operands = 0 : i64, tpu.core_type = #tpu.core_type<tc>, window_params = [{transform_indices = @transform_0, window_bounds = array<i64: 128, 128>}, {transform_indices = @transform_1, window_bounds = array<i64: 128, 128>}]} {
    %c0 = arith.constant 0 : index
    %c0_0 = arith.constant 0 : index
    %0 = vector.load %arg1[%c0, %c0_0] : memref<128x128xf32, #tpu.memory_space<vmem>>, vector<128x128xf32>
    %1 = arith.mulf %0, %0 : vector<128x128xf32>
    %cst = arith.constant dense<0.000000e+00> : vector<128xf32>
    %2 = vector.multi_reduction <add>, %1, %cst [1] : vector<128x128xf32> to vector<128xf32>
    %3 = vector.shape_cast %2 : vector<128xf32> to vector<128x1xf32>
    %cst_1 = arith.constant 1.000000e-24 : f32
    %4 = vector.broadcast %cst_1 : f32 to vector<128x1xf32>
    %5 = arith.maximumf %3, %4 : vector<128x1xf32>
    %6 = math.rsqrt %5 : vector<128x1xf32>
    %7 = vector.broadcast %6 : vector<128x1xf32> to vector<128x128xf32>
    %8 = arith.mulf %0, %7 : vector<128x128xf32>
    %9 = arith.truncf %8 : vector<128x128xf32> to vector<128x128xbf16>
    %c0_2 = arith.constant 0 : index
    %c0_3 = arith.constant 0 : index
    %10 = vector.load %arg2[%c0_2, %c0_3] : memref<128x128xbf16, #tpu.memory_space<vmem>>, vector<128x128xbf16>
    tpu.vector_store %arg2[%c0_2, %c0_3], %9 {strides = array<i32>} : memref<128x128xbf16, #tpu.memory_space<vmem>>, vector<128x128xbf16>,
    return
  }
  func.func @transform_0(%arg0: i32) -> (i32, i32) {
    %c0_i32 = arith.constant 0 : i32
    %c0_i32_0 = arith.constant 0 : i32
    return %arg0, %c0_i32 : i32, i32
  }
  func.func @transform_1(%arg0: i32) -> (i32, i32) {
    %c0_i32 = arith.constant 0 : i32
    %c0_i32_0 = arith.constant 0 : i32
    return %arg0, %c0_i32 : i32, i32
  }
}

module attributes {stable_mosaic.version = 11 : i64} {
  func.func @_pool_normalize_kernel(%arg0: i32, %arg1: memref<8x49x128xf32, #tpu.memory_space<vmem>>, %arg2: memref<8x128xbf16, #tpu.memory_space<vmem>>) attributes {dimension_semantics = [#tpu.dimension_semantics<parallel>], iteration_bounds = array<i64: 1>, scalar_prefetch = 0 : i64, scratch_operands = 0 : i64, tpu.core_type = #tpu.core_type<tc>, window_params = [{transform_indices = @transform_0, window_bounds = array<i64: 8, 49, 128>}, {transform_indices = @transform_1, window_bounds = array<i64: 8, 128>}]} {
    %c0 = arith.constant 0 : index
    %c0_0 = arith.constant 0 : index
    %c0_1 = arith.constant 0 : index
    %0 = vector.load %arg1[%c0, %c0_0, %c0_1] : memref<8x49x128xf32, #tpu.memory_space<vmem>>, vector<8x49x128xf32>
    %cst = arith.constant dense<0.000000e+00> : vector<8x128xf32>
    %1 = vector.multi_reduction <add>, %0, %cst [1] : vector<8x49x128xf32> to vector<8x128xf32>
    %cst_2 = arith.constant 4.900000e+01 : f32
    %2 = vector.broadcast %cst_2 : f32 to vector<8x128xf32>
    %3 = arith.divf %1, %2 : vector<8x128xf32>
    %4 = arith.mulf %3, %3 : vector<8x128xf32>
    %cst_3 = arith.constant dense<0.000000e+00> : vector<8xf32>
    %5 = vector.multi_reduction <add>, %4, %cst_3 [1] : vector<8x128xf32> to vector<8xf32>
    %6 = vector.shape_cast %5 : vector<8xf32> to vector<8x1xf32>
    %cst_4 = arith.constant 1.000000e-24 : f32
    %7 = vector.broadcast %cst_4 : f32 to vector<8x1xf32>
    %8 = arith.maximumf %6, %7 : vector<8x1xf32>
    %9 = math.rsqrt %8 : vector<8x1xf32>
    %10 = vector.broadcast %9 : vector<8x1xf32> to vector<8x128xf32>
    %11 = arith.mulf %3, %10 : vector<8x128xf32>
    %12 = arith.truncf %11 : vector<8x128xf32> to vector<8x128xbf16>
    %c0_5 = arith.constant 0 : index
    %c0_6 = arith.constant 0 : index
    %13 = vector.load %arg2[%c0_5, %c0_6] : memref<8x128xbf16, #tpu.memory_space<vmem>>, vector<8x128xbf16>
    tpu.vector_store %arg2[%c0_5, %c0_6], %12 {strides = array<i32>} : memref<8x128xbf16, #tpu.memory_space<vmem>>, vector<8x128xbf16>,
    return
  }
  func.func @transform_0(%arg0: i32) -> (i32, i32, i32) {
    %c0_i32 = arith.constant 0 : i32
    %c0_i32_0 = arith.constant 0 : i32
    %c0_i32_1 = arith.constant 0 : i32
    return %arg0, %c0_i32, %c0_i32_0 : i32, i32, i32
  }
  func.func @transform_1(%arg0: i32) -> (i32, i32) {
    %c0_i32 = arith.constant 0 : i32
    %c0_i32_0 = arith.constant 0 : i32
    return %arg0, %c0_i32 : i32, i32
  }
}

module attributes {stable_mosaic.version = 11 : i64} {
  func.func @_arcface_kernel(%arg0: i32, %arg1: i32, %arg2: memref<8x128xbf16, #tpu.memory_space<vmem>>, %arg3: memref<128x128xbf16, #tpu.memory_space<vmem>>, %arg4: memref<8x1xi32, #tpu.memory_space<vmem>>, %arg5: memref<8x128xf32, #tpu.memory_space<vmem>>) attributes {dimension_semantics = [#tpu.dimension_semantics<parallel>, #tpu.dimension_semantics<parallel>], iteration_bounds = array<i64: 1, 3>, scalar_prefetch = 0 : i64, scratch_operands = 0 : i64, tpu.core_type = #tpu.core_type<tc>, window_params = [{transform_indices = @transform_0, window_bounds = array<i64: 8, 128>}, {transform_indices = @transform_1, window_bounds = array<i64: 128, 128>}, {transform_indices = @transform_2, window_bounds = array<i64: 8, 1>}, {transform_indices = @transform_3, window_bounds = array<i64: 8, 128>}]} {
    %c0 = arith.constant 0 : index
    %c0_0 = arith.constant 0 : index
    %0 = vector.load %arg2[%c0, %c0_0] : memref<8x128xbf16, #tpu.memory_space<vmem>>, vector<8x128xbf16>
    %c0_1 = arith.constant 0 : index
    %c0_2 = arith.constant 0 : index
    %1 = vector.load %arg3[%c0_1, %c0_2] : memref<128x128xbf16, #tpu.memory_space<vmem>>, vector<128x128xbf16>
    %cst = arith.constant dense<0.000000e+00> : vector<8x128xf32>
    %2 = tpu.matmul %0, %1, %cst {dimension_numbers = #tpu.dot_dimension_numbers<[1], [1], [0], [0], [0, 0, 1, 0], [], []>} : vector<8x128xbf16>, vector<128x128xbf16>, vector<8x128xf32> -> vector<8x128xf32>
    %3 = arith.mulf %2, %2 : vector<8x128xf32>
    %cst_3 = arith.constant 1.000000e+00 : f32
    %4 = vector.broadcast %cst_3 : f32 to vector<8x128xf32>
    %5 = arith.subf %4, %3 : vector<8x128xf32>
    %cst_4 = arith.constant 0.000000e+00 : f32
    %6 = vector.broadcast %cst_4 : f32 to vector<8x128xf32>
    %7 = arith.maximumf %5, %6 : vector<8x128xf32>
    %8 = math.sqrt %7 : vector<8x128xf32>
    %cst_5 = arith.constant 0.87758255 : f32
    %9 = vector.broadcast %cst_5 : f32 to vector<8x128xf32>
    %10 = arith.mulf %2, %9 : vector<8x128xf32>
    %cst_6 = arith.constant 0.47942555 : f32
    %11 = vector.broadcast %cst_6 : f32 to vector<8x128xf32>
    %12 = arith.mulf %8, %11 : vector<8x128xf32>
    %13 = arith.subf %10, %12 : vector<8x128xf32>
    %cst_7 = arith.constant -0.87758255 : f32
    %14 = vector.broadcast %cst_7 : f32 to vector<8x128xf32>
    %15 = arith.cmpf ogt, %2, %14 : vector<8x128xf32>
    %cst_8 = arith.constant 0.239712775 : f32
    %16 = vector.broadcast %cst_8 : f32 to vector<8x128xf32>
    %17 = arith.subf %2, %16 : vector<8x128xf32>
    %18 = arith.select %15, %13, %17 : vector<8x128xi1>, vector<8x128xf32>
    %19 = tpu.iota {dimensions = array<i32: 1>} : vector<8x128xi32>
    %c128_i32 = arith.constant 128 : i32
    %20 = arith.muli %arg1, %c128_i32 : i32
    %21 = vector.broadcast %20 : i32 to vector<8x128xi32>
    %22 = arith.addi %19, %21 : vector<8x128xi32>
    %c0_9 = arith.constant 0 : index
    %c0_10 = arith.constant 0 : index
    %23 = vector.load %arg4[%c0_9, %c0_10] : memref<8x1xi32, #tpu.memory_space<vmem>>, vector<8x1xi32>
    %24 = vector.broadcast %23 : vector<8x1xi32> to vector<8x128xi32>
    %25 = arith.cmpi eq, %22, %24 : vector<8x128xi32>
    %26 = arith.extui %25 : vector<8x128xi1> to vector<8x128xi32>
    %27 = arith.sitofp %26 : vector<8x128xi32> to vector<8x128xf32>
    %28 = arith.mulf %27, %18 : vector<8x128xf32>
    %cst_11 = arith.constant 1.000000e+00 : f32
    %29 = vector.broadcast %cst_11 : f32 to vector<8x128xf32>
    %30 = arith.subf %29, %27 : vector<8x128xf32>
    %31 = arith.mulf %30, %2 : vector<8x128xf32>
    %32 = arith.addf %28, %31 : vector<8x128xf32>
    %cst_12 = arith.constant 3.000000e+01 : f32
    %33 = vector.broadcast %cst_12 : f32 to vector<8x128xf32>
    %34 = arith.mulf %32, %33 : vector<8x128xf32>
    %c0_13 = arith.constant 0 : index
    %c0_14 = arith.constant 0 : index
    %35 = vector.load %arg5[%c0_13, %c0_14] : memref<8x128xf32, #tpu.memory_space<vmem>>, vector<8x128xf32>
    tpu.vector_store %arg5[%c0_13, %c0_14], %34 {strides = array<i32>} : memref<8x128xf32, #tpu.memory_space<vmem>>, vector<8x128xf32>,
    return
  }
  func.func @transform_0(%arg0: i32, %arg1: i32) -> (i32, i32) {
    %c0_i32 = arith.constant 0 : i32
    %c0_i32_0 = arith.constant 0 : i32
    return %arg0, %c0_i32 : i32, i32
  }
  func.func @transform_1(%arg0: i32, %arg1: i32) -> (i32, i32) {
    %c0_i32 = arith.constant 0 : i32
    %c0_i32_0 = arith.constant 0 : i32
    return %arg1, %c0_i32 : i32, i32
  }
  func.func @transform_2(%arg0: i32, %arg1: i32) -> (i32, i32) {
    %c0_i32 = arith.constant 0 : i32
    %c0_i32_0 = arith.constant 0 : i32
    return %arg0, %c0_i32 : i32, i32
  }
  func.func @transform_3(%arg0: i32, %arg1: i32) -> (i32, i32) {
    %c0_i32 = arith.constant 0 : i32
    return %arg0, %arg1 : i32, i32
  }
}

</mosaic_0001>

<bundles_post_ra>
// kernel: shopee_net_forward.4
= control target key start
LH: loop header
LB: loop body
LE: loop exit
PB: predicated region body
PF: predicated region fallthrough
CT: control target
= control target key end

     0   :  { %s516_s6 = smov 0   ;;  %s645_s0 = inlined_call_operand.vmem [shape: f32[384,128], index: 0, kind: input, shape index: {}]   ;;  %s646_s1 = inlined_call_operand.vmem [shape: bf16[384,128], index: 1, kind: output, shape index: {}]  }
   0x1 LB: > { %s368_s7 = sadd.s32 4294967295, %s504_s6   ;;  %p372_p0 = scmp.ge.s32.totalorder %s504_s6, 1  ;;  %s504_s6 = sphi %s516_s6, %s11_s6  }
   0x2   : > { %p88_p1 = scmp.lt.s32.totalorder %s504_s6, 4 }
   0x4   : > { %p89_p2 = pnand %p372_p0, %p88_p1 }
   0x5   : > { %s373_s8 = sshll.u32 (!%p89_p2), %s368_s7, 4 }
   0x6   : > { %92 = sbr.rel (%p89_p2) target bundleno = 208 (0xd0), region = 24  ;;  %p109_p3 = scmp.lt.s32.totalorder (!%p89_p2), %s373_s8, 47 }
   0xd   : > { %s648_s8 = smov (!%p109_p3, %s373_s8), 47 }
   0xe   : > { %s374_s9 = sshll.u32 %s648_s8, 3  ;;  %s376_s13 = sshll.u32 %s648_s8, 2 }
   0xf   : > { %s530_s12 = scalar_lea.vmem %s645_s0, %s374_s9  ;;  %s619_s16 = scalar_lea.vmem %s646_s1, %s376_s13 }
  0x10   : > { %v533_v0 = vld [vmem:[%s530_s12 + $0x10] sm:$0xff]  ;;  %v536_v1 = vld [vmem:[%s530_s12] sm:$0xff]  ;;  %v539_v2 = vld [vmem:[%s530_s12 + $0x18] sm:$0xff] }
  0x11   : > { %v138_v3 = vmul.f32 %v533_v0, %v533_v0  ;;  %v136_v4 = vmul.f32 %v536_v1, %v536_v1  ;;  %v546_v5 = vld [vmem:[%s530_s12 + $0x8] sm:$0xff]  ;;  %v139_v6 = vmul.f32 %v539_v2, %v539_v2  ;;  %v556_v9 = vld [vmem:[%s530_s12 + $0x20] sm:$0xff]  ;;  %v563_v12 = vld [vmem:[%s530_s12 + $0x38] sm:$0xff] }
  0x12   : > { %v137_v7 = vmul.f32 %v546_v5, %v546_v5  ;;  %v553_v8 = vld [vmem:[%s530_s12 + $0x28] sm:$0xff]  ;;  %v140_v11 = vmul.f32 %v556_v9, %v556_v9  ;;  %v566_v13 = vld [vmem:[%s530_s12 + $0x30] sm:$0xff]  ;;  %v143_v14 = vmul.f32 %v563_v12, %v563_v12  ;;  %v576_v17 = vld [vmem:[%s530_s12 + $0x40] sm:$0xff] }
  0x13   : > { %156 = vadd.xlane.f32.xlu1 %v138_v3  ;;  %152 = vadd.xlane.f32.xlu0 %v136_v4  ;;  %v141_v10 = vmul.f32 %v553_v8, %v553_v8  ;;  %v142_v15 = vmul.f32 %v566_v13, %v566_v13  ;;  %v573_v16 = vld [vmem:[%s530_s12 + $0x48] sm:$0xff]  ;;  %v144_v19 = vmul.f32 %v576_v17, %v576_v17  ;;  %v583_v20 = vld [vmem:[%s530_s12 + $0x58] sm:$0xff]  ;;  %v586_v21 = vld [vmem:[%s530_s12 + $0x50] sm:$0xff] }
  0x14   : > { %v145_v18 = vmul.f32 %v573_v16, %v573_v16  ;;  %v147_v22 = vmul.f32 %v583_v20, %v583_v20  ;;  %v146_v23 = vmul.f32 %v586_v21, %v586_v21  ;;  %v593_v24 = vld [vmem:[%s530_s12 + $0x68] sm:$0xff]  ;;  %v596_v25 = vld [vmem:[%s530_s12 + $0x60] sm:$0xff]  ;;  %v603_v28 = vld [vmem:[%s530_s12 + $0x78] sm:$0xff] }
  0x15   : > { %v149_v26 = vmul.f32 %v593_v24, %v593_v24  ;;  %v148_v27 = vmul.f32 %v596_v25, %v596_v25  ;;  %v606_v29 = vld [vmem:[%s530_s12 + $0x70] sm:$0xff]  ;;  %v151_v30 = vmul.f32 %v603_v28, %v603_v28 }
  0x16   : > { %v150_v31 = vmul.f32 %v606_v29, %v606_v29 }
  0x17   : > { %158 = vadd.xlane.f32.xlu1 %v139_v6  ;;  %154 = vadd.xlane.f32.xlu0 %v137_v7 }
  0x1b   : > { %162 = vadd.xlane.f32.xlu1 %v141_v10  ;;  %160 = vadd.xlane.f32.xlu0 %v140_v11 }
  0x1f   : > { %166 = vadd.xlane.f32.xlu1 %v143_v14  ;;  %164 = vadd.xlane.f32.xlu0 %v142_v15 }
  0x23   : > { %170 = vadd.xlane.f32.xlu1 %v145_v18  ;;  %168 = vadd.xlane.f32.xlu0 %v144_v19 }
  0x27   : > { %174 = vadd.xlane.f32.xlu1 %v147_v22  ;;  %172 = vadd.xlane.f32.xlu0 %v146_v23 }
  0x2b   : > { %178 = vadd.xlane.f32.xlu1 %v149_v26  ;;  %176 = vadd.xlane.f32.xlu0 %v148_v27 }
  0x2f   : > { %182 = vadd.xlane.f32.xlu1 %v151_v30  ;;  %180 = vadd.xlane.f32.xlu0 %v150_v31 }
  0xa0   : > { %v157_v32 = vpop.xlane.xlu1 %156  ;;  %v153_v33 = vpop.xlane.xlu0 %152 }
  0xa1   : > { %v186_v34 = vmax.f32 %v157_v32, 1e-24  ;;  %v184_v35 = vmax.f32 %v153_v33, 1e-24 }
  0xa3   : > { %466 = vrsqrt.f32 %v186_v34 }
  0xa4   : > { %v159_v36 = vpop.xlane.xlu1 %158  ;;  %v155_v37 = vpop.xlane.xlu0 %154  ;;  %468 = vrsqrt.f32 %v184_v35 }
  0xa5   : > { %v187_v38 = vmax.f32 %v159_v36, 1e-24  ;;  %v185_v39 = vmax.f32 %v155_v37, 1e-24 }
  0xa7   : > { %470 = vrsqrt.f32 %v187_v38 }
  0xa8   : > { %472 = vrsqrt.f32 %v185_v39  ;;  %v163_v40 = vpop.xlane.xlu1 %162  ;;  %v161_v41 = vpop.xlane.xlu0 %160 }
  0xa9   : > { %v189_v42 = vmax.f32 %v163_v40, 1e-24  ;;  %v188_v43 = vmax.f32 %v161_v41, 1e-24 }
  0xab   : > { %474 = vrsqrt.f32 %v189_v42 }
  0xac   : > { %476 = vrsqrt.f32 %v188_v43  ;;  %v167_v44 = vpop.xlane.xlu1 %166  ;;  %v165_v45 = vpop.xlane.xlu0 %164 }
  0xad   : > { %v191_v46 = vmax.f32 %v167_v44, 1e-24  ;;  %v190_v47 = vmax.f32 %v165_v45, 1e-24  ;;  %v467_v48 = vpop.eup %466 }
  0xae   : > { %v469_v49 = vpop.eup %468  ;;  %v218_v56 = vmul.f32 %v467_v48, %v533_v0 }
  0xaf   : > { %478 = vrsqrt.f32 %v191_v46  ;;  %v216_v58 = vmul.f32 %v469_v49, %v536_v1 }
  0xb0   : > { %480 = vrsqrt.f32 %v190_v47  ;;  %v171_v50 = vpop.xlane.xlu1 %170  ;;  %v169_v51 = vpop.xlane.xlu0 %168 }
  0xb1   : > { %v471_v52 = vpop.eup %470  ;;  %v193_v53 = vmax.f32 %v171_v50, 1e-24  ;;  %v192_v54 = vmax.f32 %v169_v51, 1e-24 }
  0xb2   : > { %v473_v55 = vpop.eup %472  ;;  %v219_v57 = vmul.f32 %v471_v52, %v539_v2 }
  0xb3   : > { %v217_v59 = vmul.f32 %v473_v55, %v546_v5  ;;  %482 = vrsqrt.f32 %v193_v53 }
  0xb4   : > { %v419_v60 = vpack.c.bf16 %v219_v57, %v218_v56  ;;  %484 = vrsqrt.f32 %v192_v54  ;;  %v175_v61 = vpop.xlane.xlu1 %174  ;;  %v173_v62 = vpop.xlane.xlu0 %172 }
  0xb5   : > { %v475_v63 = vpop.eup %474  ;;  %v414_v0 = vpack.c.bf16 %v217_v59, %v216_v58  ;;  %v195_v3 = vmax.f32 %v175_v61, 1e-24  ;;  %v194_v2 = vmax.f32 %v173_v62, 1e-24 }
  0xb6   : > { %v477_v1 = vpop.eup %476  ;;  %451 = vst [vmem:[%s619_s16 + $0x8] sm:$0xff] %v419_v60   ;;  %v221_v4 = vmul.f32 %v475_v63, %v553_v8 }
  0xb7   : > { %415 = vst [vmem:[%s619_s16] sm:$0xff] %v414_v0   ;;  %v220_v6 = vmul.f32 %v477_v1, %v556_v9  ;;  %486 = vrsqrt.f32 %v195_v3 }
  0xb8   : > { %488 = vrsqrt.f32 %v194_v2  ;;  %v179_v5 = vpop.xlane.xlu1 %178  ;;  %v177_v7 = vpop.xlane.xlu0 %176 }
  0xb9   : > { %v479_v10 = vpop.eup %478  ;;  %v424_v11 = vpack.c.bf16 %v221_v4, %v220_v6  ;;  %v197_v14 = vmax.f32 %v179_v5, 1e-24  ;;  %v196_v15 = vmax.f32 %v177_v7, 1e-24 }
  0xba   : > { %v481_v18 = vpop.eup %480  ;;  %v223_v19 = vmul.f32 %v479_v10, %v563_v12 }
  0xbb   : > { %452 = vst [vmem:[%s619_s16 + $0x10] sm:$0xff] %v424_v11   ;;  %v222_v22 = vmul.f32 %v481_v18, %v566_v13  ;;  %490 = vrsqrt.f32 %v197_v14 }
  0xbc   : > { %492 = vrsqrt.f32 %v196_v15  ;;  %v183_v8 = vpop.xlane.xlu1 %182  ;;  %v181_v9 = vpop.xlane.xlu0 %180 }
  0xbd   : > { %v483_v23 = vpop.eup %482  ;;  %v429_v26 = vpack.c.bf16 %v223_v19, %v222_v22  ;;  %v199_v27 = vmax.f32 %v183_v8, 1e-24  ;;  %v198_v30 = vmax.f32 %v181_v9, 1e-24 }
  0xbe   : > { %v485_v31 = vpop.eup %484  ;;  %v225_v32 = vmul.f32 %v483_v23, %v573_v16 }
  0xbf   : > { %453 = vst [vmem:[%s619_s16 + $0x18] sm:$0xff] %v429_v26   ;;  %v224_v33 = vmul.f32 %v485_v31, %v576_v17  ;;  %494 = vrsqrt.f32 %v199_v27 }
  0xc0   : > { %496 = vrsqrt.f32 %v198_v30 }
  0xc1   : > { %v487_v12 = vpop.eup %486  ;;  %v434_v13 = vpack.c.bf16 %v225_v32, %v224_v33 }
  0xc2   : > { %v489_v34 = vpop.eup %488  ;;  %v227_v35 = vmul.f32 %v487_v12, %v583_v20 }
  0xc3   : > { %454 = vst [vmem:[%s619_s16 + $0x20] sm:$0xff] %v434_v13   ;;  %v226_v36 = vmul.f32 %v489_v34, %v586_v21 }
  0xc5   : > { %v491_v37 = vpop.eup %490  ;;  %v439_v38 = vpack.c.bf16 %v227_v35, %v226_v36 }
  0xc6   : > { %v493_v39 = vpop.eup %492  ;;  %v229_v16 = vmul.f32 %v491_v37, %v593_v24 }
  0xc7   : > { %455 = vst [vmem:[%s619_s16 + $0x28] sm:$0xff] %v439_v38   ;;  %v228_v17 = vmul.f32 %v493_v39, %v596_v25 }
  0xc9   : > { %v495_v40 = vpop.eup %494  ;;  %v444_v41 = vpack.c.bf16 %v229_v16, %v228_v17 }
  0xca   : > { %v497_v42 = vpop.eup %496  ;;  %v231_v43 = vmul.f32 %v495_v40, %v603_v28 }
  0xcb   : > { %456 = vst [vmem:[%s619_s16 + $0x30] sm:$0xff] %v444_v41   ;;  %v230_v20 = vmul.f32 %v497_v42, %v606_v29 }
  0xcd   : > { %v449_v44 = vpack.c.bf16 %v231_v43, %v230_v20 }
  0xcf   : > { %457 = vst [vmem:[%s619_s16 + $0x38] sm:$0xff] %v449_v44  }
  0xd0 PF: > { %s11_s6 = sadd.s32 1, %s504_s6  }
  0xd1   : > { %p8_p4 = scmp.ge.s32.totalorder %s11_s6, 5  }
  0xd3   :  { %10 = sbr.rel (!%p8_p4) target bundleno = 1 (0x1), region = 54 }

// kernel: shopee_net_forward.3
= control target key start
LH: loop header
LB: loop body
LE: loop exit
PB: predicated region body
PF: predicated region fallthrough
CT: control target
= control target key end

     0   :  { %vm69_vm0 = vcmask 1040384   ;;  %vm194_vm1 = vcmask 1041409   ;;  %vm196_vm2 = vcmask 1042434   ;;  %vm198_vm3 = vcmask 1043459   ;;  %s529_s0 = inlined_call_operand.vmem [shape: f32[8,49,128], index: 0, kind: input, shape index: {}]   ;;  %s530_s1 = inlined_call_operand.vmem [shape: bf16[8,128], index: 1, kind: output, shape index: {}]  }
   0x1   :  { %v8_v0 = vld [vmem:[%s529_s0] sm:$0xff]  ;;  %v9_v1 = vld [vmem:[%s529_s0 + $0x8] sm:$0xff]  ;;  %v10_v2 = vld [vmem:[%s529_s0 + $0x10] sm:$0xff]  ;;  %vm200_vm4 = vcmask 1044484   ;;  %vm202_vm5 = vcmask 1045509   ;;  %vm204_vm6 = vcmask 1046534  }
   0x2   :  { %v64_v3 = vadd.f32 %v9_v1, %v8_v0  ;;  %v11_v4 = vld [vmem:[%s529_s0 + $0x18] sm:$0xff]  ;;  %v16_v6 = vld [vmem:[%s529_s0 + $0x40] sm:$0xff]  ;;  %v17_v8 = vld [vmem:[%s529_s0 + $0x48] sm:$0xff]  ;;  %vm206_vm7 = vcmask 1047559  }
   0x3   :  { %v15_v5 = vld [vmem:[%s529_s0 + $0x38] sm:$0xff]  ;;  %v12_v7 = vld [vmem:[%s529_s0 + $0x20] sm:$0xff]  ;;  %v13_v11 = vld [vmem:[%s529_s0 + $0x28] sm:$0xff] }
   0x4   :  { %v65_v9 = vadd.f32 %v64_v3, %v10_v2  ;;  %v78_v10 = vadd.f32 %v16_v6, %v15_v5  ;;  %v18_v12 = vld [vmem:[%s529_s0 + $0x50] sm:$0xff]  ;;  %v23_v15 = vld [vmem:[%s529_s0 + $0x78] sm:$0xff]  ;;  %v24_v16 = vld [vmem:[%s529_s0 + $0x80] sm:$0xff] }
   0x5   :  { %v22_v13 = vld [vmem:[%s529_s0 + $0x70] sm:$0xff]  ;;  %v19_v19 = vld [vmem:[%s529_s0 + $0x58] sm:$0xff]  ;;  %v21_v20 = vld [vmem:[%s529_s0 + $0x68] sm:$0x1] }
   0x6   :  { %v14_v14 = vld [vmem:[%s529_s0 + $0x30] sm:$0x1]  ;;  %v66_v17 = vadd.f32 %v65_v9, %v11_v4  ;;  %v79_v18 = vadd.f32 %v78_v10, %v17_v8  ;;  %v25_v21 = vld [vmem:[%s529_s0 + $0x88] sm:$0xff]  ;;  %v91_v22 = vadd.f32 %v23_v15, %v22_v13  ;;  %v31_v25 = vld [vmem:[%s529_s0 + $0xb8] sm:$0xff]  ;;  %v83_v43 = vsel %vm69_vm0, %v21_v20, 0.0 }
   0x7   :  { %v29_v23 = vld [vmem:[%s529_s0 + $0xa8] sm:$0xff]  ;;  %v30_v24 = vld [vmem:[%s529_s0 + $0xb0] sm:$0xff]  ;;  %v20_v28 = vld [vmem:[%s529_s0 + $0x60] sm:$0xff]  ;;  %v70_v31 = vsel %vm69_vm0, %v14_v14, 0.0 }
   0x8   :  { %v67_v26 = vadd.f32 %v66_v17, %v12_v7  ;;  %v80_v27 = vadd.f32 %v79_v18, %v18_v12  ;;  %v26_v29 = vld [vmem:[%s529_s0 + $0x90] sm:$0xff]  ;;  %v28_v30 = vld [vmem:[%s529_s0 + $0xa0] sm:$0x1]  ;;  %v92_v32 = vadd.f32 %v91_v22, %v24_v16  ;;  %v104_v33 = vadd.f32 %v30_v24, %v29_v23  ;;  %v27_v34 = vld [vmem:[%s529_s0 + $0x98] sm:$0xff] }
   0x9   :  { %v32_v35 = vld [vmem:[%s529_s0 + $0xc0] sm:$0xff]  ;;  %v37_v37 = vld [vmem:[%s529_s0 + $0xe8] sm:$0xff]  ;;  %v35_v41 = vld [vmem:[%s529_s0 + $0xd8] sm:$0x1]  ;;  %v96_v56 = vsel %vm69_vm0, %v28_v30, 0.0 }
   0xa   :  { %v36_v36 = vld [vmem:[%s529_s0 + $0xe0] sm:$0xff]  ;;  %v68_v38 = vadd.f32 %v67_v26, %v13_v11  ;;  %v81_v39 = vadd.f32 %v80_v27, %v19_v19  ;;  %v33_v40 = vld [vmem:[%s529_s0 + $0xc8] sm:$0xff]  ;;  %v38_v42 = vld [vmem:[%s529_s0 + $0xf0] sm:$0xff]  ;;  %v93_v44 = vadd.f32 %v92_v32, %v25_v21  ;;  %v105_v45 = vadd.f32 %v104_v33, %v31_v25 }
   0xb   :  { %v117_v46 = vadd.f32 %v37_v37, %v36_v36  ;;  %v39_v47 = vld [vmem:[%s529_s0 + $0xf8] sm:$0xff]  ;;  %v42_v48 = vld [vmem:[%s529_s0 + $0x110] sm:$0x1]  ;;  %v44_v53 = vld [vmem:[%s529_s0 + $0x120] sm:$0xff]  ;;  %v109_v0 = vsel %vm69_vm0, %v35_v41, 0.0 }
   0xc   :  { %v43_v49 = vld [vmem:[%s529_s0 + $0x118] sm:$0xff]  ;;  %v71_v50 = vadd.f32 %v70_v31, %v68_v38  ;;  %v82_v51 = vadd.f32 %v81_v39, %v20_v28  ;;  %v34_v52 = vld [vmem:[%s529_s0 + $0xd0] sm:$0xff]  ;;  %v45_v54 = vld [vmem:[%s529_s0 + $0x128] sm:$0xff]  ;;  %v94_v55 = vadd.f32 %v93_v44, %v26_v29  ;;  %v106_v57 = vadd.f32 %v105_v45, %v32_v35 }
   0xd   :  { %v118_v58 = vadd.f32 %v117_v46, %v38_v42  ;;  %v40_v59 = vld [vmem:[%s529_s0 + $0x100] sm:$0xff]  ;;  %v46_v60 = vld [vmem:[%s529_s0 + $0x130] sm:$0xff]  ;;  %v49_v61 = vld [vmem:[%s529_s0 + $0x148] sm:$0x1]  ;;  %v130_v1 = vadd.f32 %v44_v53, %v43_v49  ;;  %v122_v8 = vsel %vm69_vm0, %v42_v48, 0.0 }
   0xe   :  { %v72_v62 = vrot.slane %v71_v50, 4  ;;  %v84_v63 = vadd.f32 %v83_v43, %v82_v51  ;;  %v50_v2 = vld [vmem:[%s529_s0 + $0x150] sm:$0xff]  ;;  %v51_v3 = vld [vmem:[%s529_s0 + $0x158] sm:$0xff]  ;;  %v52_v4 = vld [vmem:[%s529_s0 + $0x160] sm:$0xff]  ;;  %v95_v5 = vadd.f32 %v94_v55, %v27_v34  ;;  %v107_v6 = vadd.f32 %v106_v57, %v33_v40 }
   0xf   :  { %v119_v7 = vadd.f32 %v118_v58, %v39_v47  ;;  %v41_v9 = vld [vmem:[%s529_s0 + $0x108] sm:$0xff]  ;;  %v131_v12 = vadd.f32 %v130_v1, %v45_v54  ;;  %v143_v13 = vadd.f32 %v51_v3, %v50_v2  ;;  %v47_v14 = vld [vmem:[%s529_s0 + $0x138] sm:$0xff]  ;;  %v56_v16 = vld [vmem:[%s529_s0 + $0x180] sm:$0x1]  ;;  %v135_v20 = vsel %vm69_vm0, %v49_v61, 0.0 }
  0x10   :  { %v73_v10 = vadd.f32 %v72_v62, %v71_v50  ;;  %v85_v11 = vrot.slane %v84_v63, 4  ;;  %v53_v15 = vld [vmem:[%s529_s0 + $0x168] sm:$0xff]  ;;  %v97_v17 = vadd.f32 %v96_v56, %v95_v5  ;;  %v108_v18 = vadd.f32 %v107_v6, %v34_v52  ;;  %v58_v22 = vld [vmem:[%s529_s0 + $0x190] sm:$0xff]  ;;  %v48_v27 = vld [vmem:[%s529_s0 + $0x140] sm:$0xff] }
  0x11   :  { %v120_v19 = vadd.f32 %v119_v7, %v40_v59  ;;  %v57_v21 = vld [vmem:[%s529_s0 + $0x188] sm:$0xff]  ;;  %v132_v25 = vadd.f32 %v131_v12, %v46_v60  ;;  %v144_v26 = vadd.f32 %v143_v13, %v52_v4  ;;  %v54_v28 = vld [vmem:[%s529_s0 + $0x170] sm:$0xff]  ;;  %v148_v32 = vsel %vm69_vm0, %v56_v16, 0.0  ;;  %v59_v33 = vld [vmem:[%s529_s0 + $0x198] sm:$0xff] }
  0x12   :  { %v74_v23 = vrot.slane %v73_v10, 2  ;;  %v86_v24 = vadd.f32 %v85_v11, %v84_v63  ;;  %v98_v29 = vrot.slane %v97_v17, 4  ;;  %v110_v30 = vadd.f32 %v109_v0, %v108_v18  ;;  %v55_v38 = vld [vmem:[%s529_s0 + $0x178] sm:$0xff]  ;;  %v60_v43 = vld [vmem:[%s529_s0 + $0x1a0] sm:$0xff]  ;;  %v61_v53 = vld [vmem:[%s529_s0 + $0x1a8] sm:$0xff] }
  0x13   :  { %v121_v31 = vadd.f32 %v120_v19, %v41_v9  ;;  %v133_v36 = vadd.f32 %v132_v25, %v47_v14  ;;  %v145_v37 = vadd.f32 %v144_v26, %v53_v15  ;;  %v156_v42 = vadd.f32 %v58_v22, %v57_v21  ;;  %v63_v48 = vld [vmem:[%s529_s0 + $0x1b8] sm:$0x1]  ;;  %v62_v62 = vld [vmem:[%s529_s0 + $0x1b0] sm:$0xff] }
  0x14   :  { %v75_v34 = vadd.f32 %v74_v23, %v73_v10  ;;  %v87_v35 = vrot.slane %v86_v24, 2  ;;  %v99_v39 = vadd.f32 %v98_v29, %v97_v17  ;;  %v111_v40 = vrot.slane %v110_v30, 4 }
  0x15   :  { %v123_v41 = vadd.f32 %v122_v8, %v121_v31  ;;  %v134_v46 = vadd.f32 %v133_v36, %v48_v27  ;;  %v146_v47 = vadd.f32 %v145_v37, %v54_v28  ;;  %v157_v52 = vadd.f32 %v156_v42, %v59_v33 }
  0x16   :  { %v76_v44 = vrot.slane %v75_v34, 1  ;;  %v88_v45 = vadd.f32 %v87_v35, %v86_v24  ;;  %v100_v49 = vrot.slane %v99_v39, 2  ;;  %v112_v50 = vadd.f32 %v111_v40, %v110_v30 }
  0x17   :  { %v124_v51 = vrot.slane %v123_v41, 4  ;;  %v136_v56 = vadd.f32 %v135_v20, %v134_v46  ;;  %v147_v57 = vadd.f32 %v146_v47, %v55_v38  ;;  %v158_v61 = vadd.f32 %v157_v52, %v60_v43 }
  0x18   :  { %v77_v54 = vadd.f32 %v76_v44, %v75_v34  ;;  %v89_v55 = vrot.slane %v88_v45, 1  ;;  %v101_v58 = vadd.f32 %v100_v49, %v99_v39  ;;  %v113_v59 = vrot.slane %v112_v50, 2 }
  0x19   :  { %v125_v60 = vadd.f32 %v124_v51, %v123_v41  ;;  %v137_v0 = vrot.slane %v136_v56, 4  ;;  %v149_v1 = vadd.f32 %v148_v32, %v147_v57  ;;  %v161_v2 = vsel %vm69_vm0, %v63_v48, 0.0 }
  0x1a   :  { %v90_v63 = vadd.f32 %v89_v55, %v88_v45  ;;  %v102_v3 = vrot.slane %v101_v58, 1  ;;  %v114_v4 = vadd.f32 %v113_v59, %v112_v50  ;;  %v159_v6 = vadd.f32 %v158_v61, %v61_v53 }
  0x1b   :  { %v126_v5 = vrot.slane %v125_v60, 2  ;;  %v138_v7 = vadd.f32 %v137_v0, %v136_v56  ;;  %v150_v8 = vrot.slane %v149_v1, 4  ;;  %v502_v9 = vmul.f32 0.020408163, %v77_v54 }
  0x1c   :  { %v504_v10 = vmul.f32 0.020408163, %v90_v63  ;;  %v103_v11 = vadd.f32 %v102_v3, %v101_v58  ;;  %v115_v12 = vrot.slane %v114_v4, 1  ;;  %v160_v14 = vadd.f32 %v159_v6, %v62_v62 }
  0x1d   :  { %v127_v13 = vadd.f32 %v126_v5, %v125_v60  ;;  %v139_v15 = vrot.slane %v138_v7, 2  ;;  %v151_v16 = vadd.f32 %v150_v8, %v149_v1  ;;  %v178_v17 = vmul.f32 %v502_v9, %v502_v9 }
  0x1e   :  { %v179_v18 = vmul.f32 %v504_v10, %v504_v10  ;;  %v116_v19 = vadd.f32 %v115_v12, %v114_v4  ;;  %v162_v21 = vadd.f32 %v161_v2, %v160_v14  ;;  %v172_v22 = vmul.f32 0.020408163, %v103_v11 }
  0x1f   :  { %v128_v20 = vrot.slane %v127_v13, 1  ;;  %v140_v23 = vadd.f32 %v139_v15, %v138_v7  ;;  %v152_v24 = vrot.slane %v151_v16, 2 }
  0x20   :  { %v195_v25 = vsel %vm194_vm1, %v179_v18, %v178_v17  ;;  %v163_v27 = vrot.slane %v162_v21, 4  ;;  %v173_v28 = vmul.f32 0.020408163, %v116_v19  ;;  %v180_v29 = vmul.f32 %v172_v22, %v172_v22 }
  0x21   :  { %v129_v26 = vadd.f32 %v128_v20, %v127_v13  ;;  %v141_v30 = vrot.slane %v140_v23, 1  ;;  %v153_v31 = vadd.f32 %v152_v24, %v151_v16 }
  0x22   :  { %v164_v32 = vadd.f32 %v163_v27, %v162_v21  ;;  %v181_v34 = vmul.f32 %v173_v28, %v173_v28  ;;  %v197_v35 = vsel %vm196_vm2, %v180_v29, %v195_v25 }
  0x23   :  { %v174_v33 = vmul.f32 0.020408163, %v129_v26  ;;  %v142_v36 = vadd.f32 %v141_v30, %v140_v23  ;;  %v154_v37 = vrot.slane %v153_v31, 1 }
  0x24   :  { %v165_v38 = vrot.slane %v164_v32, 2  ;;  %v199_v40 = vsel %vm198_vm3, %v181_v34, %v197_v35 }
  0x25   :  { %v182_v39 = vmul.f32 %v174_v33, %v174_v33  ;;  %v155_v41 = vadd.f32 %v154_v37, %v153_v31  ;;  %v175_v42 = vmul.f32 0.020408163, %v142_v36 }
  0x26   :  { %v166_v43 = vadd.f32 %v165_v38, %v164_v32 }
  0x27   :  { %v176_v44 = vmul.f32 0.020408163, %v155_v41  ;;  %v183_v45 = vmul.f32 %v175_v42, %v175_v42  ;;  %v201_v46 = vsel %vm200_vm4, %v182_v39, %v199_v40 }
  0x28   :  { %v167_v47 = vrot.slane %v166_v43, 1 }
  0x29   :  { %v184_v48 = vmul.f32 %v176_v44, %v176_v44  ;;  %v203_v50 = vsel %vm202_vm5, %v183_v45, %v201_v46 }
  0x2a   :  { %v168_v49 = vadd.f32 %v167_v47, %v166_v43 }
  0x2b   :  { %v205_v52 = vsel %vm204_vm6, %v184_v48, %v203_v50 }
  0x2c   :  { %v177_v51 = vmul.f32 0.020408163, %v168_v49 }
  0x2e   :  { %v185_v53 = vmul.f32 %v177_v51, %v177_v51 }
  0x30   :  { %v207_v54 = vsel %vm206_vm7, %v185_v53, %v205_v52 }
  0x31   :  { %209 = vadd.xlane.f32.xlu0 %v207_v54 }
  0xbe   :  { %v210_v55 = vpop.xlane.xlu0 %209 }
  0xbf   :  { %v211_v56 = vmax.f32 %v210_v55, 1e-24 }
  0xc1   :  { %314 = vrsqrt.f32 %v211_v56 }
  0xcb   :  { %v315_v57 = vpop.eup %314 }
  0xcc   :  { %v214_v58 = vrot.slane %v315_v57, 1  ;;  %v215_v59 = vrot.slane %v315_v57, 2  ;;  %v216_v60 = vrot.slane %v315_v57, 3  ;;  %v217_v61 = vrot.slane %v315_v57, 4 }
  0xcd   :  { %v218_v62 = vrot.slane %v315_v57, 5  ;;  %v219_v63 = vrot.slane %v315_v57, 6  ;;  %v220_v0 = vrot.slane %v315_v57, 7  ;;  %v229_v1 = vmul.f32 %v315_v57, %v502_v9 }
  0xce   :  { %v230_v2 = vmul.f32 %v214_v58, %v504_v10  ;;  %v231_v3 = vmul.f32 %v215_v59, %v172_v22  ;;  %v232_v4 = vmul.f32 %v216_v60, %v173_v28  ;;  %v233_v5 = vmul.f32 %v217_v61, %v174_v33 }
  0xcf   :  { %v234_v6 = vmul.f32 %v218_v62, %v175_v42  ;;  %v235_v7 = vmul.f32 %v219_v63, %v176_v44  ;;  %v236_v8 = vmul.f32 %v220_v0, %v177_v51  ;;  %v306_v11 = vpack.c.bf16 %v229_v1, %v229_v1 }
  0xd0   :  { %v307_v12 = vpack.c.bf16 %v230_v2, %v230_v2  ;;  %v308_v13 = vpack.c.bf16 %v231_v3, %v231_v3  ;;  %v309_v14 = vpack.c.bf16 %v232_v4, %v232_v4  ;;  %v310_v15 = vpack.c.bf16 %v233_v5, %v233_v5 }
  0xd1   :  { %v311_v16 = vpack.c.bf16 %v234_v6, %v234_v6  ;;  %v312_v17 = vpack.c.bf16 %v235_v7, %v235_v7  ;;  %v313_v18 = vpack.c.bf16 %v236_v8, %v236_v8  ;;  %v269_v23 = vunpack.c.l.b16 %v306_v11 }
  0xd2   :  { %v270_v19 = vunpack.c.l.b16 %v307_v12  ;;  %v271_v20 = vunpack.c.l.b16 %v308_v13  ;;  %v272_v21 = vunpack.c.l.b16 %v309_v14  ;;  %v273_v9 = vunpack.c.l.b16 %v310_v15 }
  0xd3   :  { %v274_v10 = vunpack.c.l.b16 %v311_v16  ;;  %v275_v25 = vunpack.c.l.b16 %v312_v17  ;;  %v276_v26 = vunpack.c.l.b16 %v313_v18 }
  0xd4   :  { %v277_v22 = vrot.slane %v270_v19, 7  ;;  %v279_v24 = vrot.slane %v271_v20, 6  ;;  %v281_v28 = vrot.slane %v272_v21, 5  ;;  %v283_v30 = vrot.slane %v273_v9, 4 }
  0xd5   :  { %v285_v32 = vrot.slane %v274_v10, 3  ;;  %v287_v34 = vrot.slane %v275_v25, 2  ;;  %v289_v36 = vrot.slane %v276_v26, 1 }
  0xd6   :  { %v278_v27 = vsel %vm194_vm1, %v277_v22, %v269_v23 }
  0xd7   :  { %v280_v29 = vsel %vm196_vm2, %v279_v24, %v278_v27 }
  0xd8   :  { %v282_v31 = vsel %vm198_vm3, %v281_v28, %v280_v29 }
  0xd9   :  { %v284_v33 = vsel %vm200_vm4, %v283_v30, %v282_v31 }
  0xda   :  { %v286_v35 = vsel %vm202_vm5, %v285_v32, %v284_v33 }
  0xdb   :  { %v288_v37 = vsel %vm204_vm6, %v287_v34, %v286_v35 }
  0xdc   :  { %v290_v38 = vsel %vm206_vm7, %v289_v36, %v288_v37 }
  0xdd   :  { %v291_v39 = vpack.c.b16 %v290_v38, %v290_v38 }
  0xdf   :  { %293 = vst [vmem:[%s530_s1] sm:$0xf] %v291_v39 }

// kernel: shopee_net_forward.5
= control target key start
LH: loop header
LB: loop body
LE: loop exit
PB: predicated region body
PF: predicated region fallthrough
CT: control target
= control target key end

     0   :  { %8 = vsyncpa [#allocation3], 0  ;;  %s822_s0 = inlined_call_operand.vmem [shape: bf16[8,128], index: 0, kind: input, shape index: {}]   ;;  %s823_s1 = inlined_call_operand.vmem [shape: bf16[384,128], index: 1, kind: input, shape index: {}]   ;;  %s824_s2 = inlined_call_operand.vmem [shape: s32[8,1], index: 2, kind: input, shape index: {}]   ;;  %s825_s3 = inlined_call_operand.hbm [shape: f32[8,384], index: 3, kind: output, shape index: {}]  }
   0x1   :  { %10 = vsyncpa [#allocation3 + $0x1], 0  ;;  %s701_s12 = smov 0   ;;  %s703_s13 = smov 0  }
   0x2   :  { %s705_s14 = smov 0   ;;  %s707_s15 = smov 0  }
   0x3   :  { %s709_s16 = smov 0   ;;  %s711_s17 = smov 0  }
   0x4 LB: > { %s474_s18 = sadd.s32 4294967295, %s675_s17   ;;  %s475_s19 = sadd.s32 4294967294, %s675_s17   ;;  %s675_s17 = sphi %s711_s17, %s16_s17   ;;  %s671_s16 = sphi %s709_s16, %s832_s16   ;;  %s667_s15 = sphi %s707_s15, %s831_s15   ;;  %s663_s14 = sphi %s705_s14, %s830_s14   ;;  %s659_s13 = sphi %s703_s13, %s829_s13   ;;  %s655_s12 = sphi %s701_s12, %s828_s12  }
   0x5   : > { %s25_s20 = sadd.s32 1, %s671_s16  ;;  %s115_s21 = sadd.s32 1, %s663_s14 }
   0x6   : > { %p26_p0 = scmp.ge.s32.totalorder %s25_s20, 3  ;;  %p125_p1 = scmp.ne.s32.totalorder %s663_s14, %s659_s13 }
   0x7   : > { %p126_p2 = scmp.eq.s32.totalorder %s474_s18, 2  ;;  %p131_p3 = scmp.ne.s32.totalorder %s659_s13, %s655_s12 }
   0x8   : > { %s834_s20 = smov (%p26_p0, %s25_s20), 0  ;;  %p132_p5 = scmp.eq.s32.totalorder %s475_s19, 2 }
   0x9   : > { %p741_p4 = por %p126_p2, %p125_p1  ;;  %s111_s23 = ssub.s32 %s671_s16, %s834_s20 }
   0xa   : > { %p480_p6 = scmp.ge.s32.totalorder %s675_s17, 1  ;;  %p113_p7 = scmp.eq.s32.totalorder %s111_s23, 0 }
   0xb   : > { %p748_p8 = por %p132_p5, %p131_p3  ;;  %p173_p9 = scmp.lt.s32.totalorder %s675_s17, 4 }
   0xc   : > { %s754_s25 = scalar_select %p113_p7, %s663_s14, %s115_s21  }
   0xd   : > { %p174_p10 = pnand %p480_p6, %p173_p9 }
   0xe   : > { %s482_s26 = sshll.u32 (!%p174_p10), %s667_s15, 4  ;;  %v677_v0 = vmov (!%p174_p10), 0.0   ;;  %vm678_vm0 = vmmov (!%p174_p10), 0   ;;  %v346_v1 = vld [vmem:[%s824_s2] sm:$0xff] (!%p174_p10)  ;;  %v679_v2 = vmov (!%p174_p10), 0   ;;  %v341_v18 = vlaneseq (!%p174_p10)  ;;  %s493_s8 = sshll.u32 (!%p174_p10), %s667_s15, 7 }
   0xf   : > { %177 = sbr.rel (%p174_p10) target bundleno = 347 (0x15b), region = 32  ;;  %508 = vmatprep.subr.bf16.mxu0 (!%p174_p10), %v677_v0  ;;  %p210_p11 = scmp.lt.s32.totalorder (!%p174_p10), %s482_s26, 47  ;;  %524 = vmatprep.mubr.msk.bf16.mxu0 (!%p174_p10), %vm678_vm0, %v677_v0  ;;  %v220_v11 = vld [vmem:[%s822_s0] sm:$0xf] (!%p174_p10)  ;;  %v344_v21 = vstv (!%p174_p10), %s493_s8 }
  0x10   : > { %586 = vset.pattern.permute.xlu0 (!%p174_p10), %v679_v2  ;;  %v342_v20 = vand.u32 (!%p174_p10), 127, %v341_v18  ;;  %s202_s9 = sand.u32 (!%p174_p10), 1, %s659_s13   ;;  %s775_s23 = scalar_lea.hbm (!%p174_p10), %s825_s3, %s493_s8 }
  0x11   : > { %348 = vperm.xlu0 (!%p174_p10), %586, %v346_v1   ;;  %s481_s10 = sshll.u32 (!%p174_p10), %s202_s9, 3  ;;  %s680_s28 = smov (!%p174_p10), [#allocation2]  }
  0x12   : > { %v345_v22 = vadd.s32 (!%p174_p10), %v344_v21, %v342_v20  ;;  %s204_s11 = scalar_lea.vmem (!%p174_p10), [#allocation2], %s481_s10 }
  0x13   : > { %s375_s18 = sshll.u32 (!%p174_p10), %s204_s11, 4  ;;  %s777_s18 = int_to_ptr.vmem [resolvable:$true] %s375_s18 }
  0x14   : > { %s597_s27 = scalar_lea.vmem (!%p174_p10), %s777_s18, 128 }
  0x15   : > { %p598_p12 = scmp.ne.s32.totalorder (!%p174_p10), %s777_s18, %s597_s27 }
  0x16   : > { %s836_s26 = smov (!%p210_p11, %s482_s26), 47 }
  0x17   : > { %s483_s29 = sshll.u32 %s836_s26, 2  ;;  %s360_s26 = scalar_lea.sflag [#allocation3], %s202_s9 }
  0x18   : > { %s213_s5 = scalar_lea.vmem %s823_s1, %s483_s29  ;;  %p599_p13 = pnand %p598_p12, %p741_p4 }
  0x19   : > { %v587_v3 = vld [vmem:[%s213_s5] sm:$0xff]   ;;  %v588_v4 = vld [vmem:[%s213_s5 + $0x8] sm:$0xff]   ;;  %v589_v5 = vld [vmem:[%s213_s5 + $0x10] sm:$0xff]   ;;  %s601_s29 = sshll.u32 %s680_s28, 4  ;;  %s602_s29 = int_to_ptr.vmem [resolvable:$false] %s601_s29 }
  0x1a   : > { %509 = vmatpush3.bf16.xpose.msra.mxu0 %v587_v3  ;;  %v590_v6 = vld [vmem:[%s213_s5 + $0x18] sm:$0xff]   ;;  %v591_v7 = vld [vmem:[%s213_s5 + $0x20] sm:$0xff]   ;;  %v592_v8 = vld [vmem:[%s213_s5 + $0x28] sm:$0xff]   ;;  %p600_p0 = pneg %p599_p13  ;;  %s603_s15 = scalar_lea.vmem %s602_s29, 256 }
  0x1b   : > { %510 = vmatprep.subr.bf16.mxu0 %v677_v0  ;;  %v593_v9 = vld [vmem:[%s213_s5 + $0x30] sm:$0xff]   ;;  %v594_v10 = vld [vmem:[%s213_s5 + $0x38] sm:$0xff]   ;;  %p604_p1 = scmp.lt.s32.totalorder %s777_s18, %s602_s29  ;;  %p605_p2 = scmp.lt.s32.totalorder %s603_s15, %s597_s27 }
  0x1d   : > { %p606_p3 = por %p605_p2, %p604_p1 }
  0x1f   : > { %p607_p5 = pnand %p606_p3, %p600_p0 }
  0x22   : > { %511 = vmatpush3.bf16.xpose.msra.mxu0 %v588_v4 }
  0x23   : > { %512 = vmatprep.subr.bf16.mxu0 %v677_v0 }
  0x2a   : > { %513 = vmatpush3.bf16.xpose.msra.mxu0 %v589_v5 }
  0x2b   : > { %514 = vmatprep.subr.bf16.mxu0 %v677_v0 }
  0x32   : > { %515 = vmatpush3.bf16.xpose.msra.mxu0 %v590_v6 }
  0x33   : > { %516 = vmatprep.subr.bf16.mxu0 %v677_v0 }
  0x3a   : > { %517 = vmatpush3.bf16.xpose.msra.mxu0 %v591_v7 }
  0x3b   : > { %518 = vmatprep.subr.bf16.mxu0 %v677_v0 }
  0x42   : > { %519 = vmatpush3.bf16.xpose.msra.mxu0 %v592_v8 }
  0x43   : > { %520 = vmatprep.subr.bf16.mxu0 %v677_v0 }
  0x4a   : > { %521 = vmatpush3.bf16.xpose.msra.mxu0 %v593_v9 }
  0x4b   : > { %522 = vmatprep.subr.bf16.mxu0 %v677_v0 }
  0x52   : > { %523 = vmatpush3.bf16.xpose.msra.mxu0 %v594_v10 }
  0x59   : > { %525 = vmatmul.mubr.bf16.vlgmr.msra.gmra.mrb[0].mxu0 %v220_v11 }
  0x90   : > { %v349_v23 = vpop.permute.xlu0 %348 }
  0x91   : > { %vm350_vm1 = vcmp.eq.s32.totalorder %v345_v22, %v349_v23 }
  0x92   : > { %v494_v27 = vsel %vm350_vm1, 1.0, %v677_v0 }
  0x93   : > { %v354_v32 = vsub.f32 1.0, %v494_v27 }
 0x12c   : > { %v319_v12 = vpop.f32.mrb[0].mxu0 }
 0x12d   : > { %v325_v13 = vmul.f32 %v319_v12, %v319_v12  ;;  %v526_v14 = vpop.f32.mrb[1].mxu0  ;;  %v335_v30 = vmul.f32 0.87758255, %v319_v12  ;;  %v492_v34 = vadd.f32 -0.23971277, %v319_v12  ;;  %v355_v37 = vmul.f32 %v354_v32, %v319_v12 }
 0x12e   : > { %v322_v16 = vpop.f32.mrb[2].mxu0  ;;  %vm338_vm4 = vcmp.gt.f32.partialorder %v319_v12, -0.87758255 }
 0x12f   : > { %v326_v15 = vsub.f32 1.0, %v325_v13  ;;  %v527_v17 = vpop.f32.mrb[3].mxu0 }
 0x131   : > { %v327_v19 = vmax.f32 %v326_v15, 0.0 }
 0x133   : > { %595 = vrsqrt.f32 %v327_v19  ;;  %vm330_vm2 = vcmp.eq.f32.partialorder %v327_v19, inf  ;;  %v333_v26 = vand.u32 2147483648, %v327_v19  ;;  %vm332_vm3 = vcmp.eq.f32.partialorder %v327_v19, 0.0 }
 0x13d   : > { %v596_v24 = vpop.eup %595 }
 0x13e   : > { %v329_v25 = vmul.f32 %v596_v24, %v327_v19 }
 0x140   : > { %v331_v28 = vsel %vm330_vm2, %v327_v19, %v329_v25 }
 0x141   : > { %v334_v29 = vsel %vm332_vm3, %v333_v26, %v331_v28 }
 0x142   : > { %v336_v31 = vmul.f32 0.47942555, %v334_v29 }
 0x144   : > { %v337_v33 = vsub.f32 %v335_v30, %v336_v31 }
 0x146   : > { %v340_v35 = vsel %vm338_vm4, %v337_v33, %v492_v34 }
 0x147   : > { %v353_v36 = vmul.f32 %v494_v27, %v340_v35 }
 0x149   : > { %v356_v38 = vadd.f32 %v355_v37, %v353_v36 }
 0x14b   : > { %v357_v39 = vmul.f32 30.0, %v356_v38 }
 0x14d   : > { %358 = vst [vmem:[%s204_s11] sm:$0xff] %v357_v39 }
 0x14e   : > { %610 = shalt.err (!%p607_p5)
}
 0x14f   : > { %s611_s30 = scalar_lea.hbm %s775_s23, 128  ;;  %s615_s6 = scalar_lea.hbm %s825_s3, 384 }
 0x150   : > { %p612_p6 = scmp.ne.s32.totalorder %s775_s23, %s611_s30  ;;  %p616_p10 = scmp.lt.u32.totalorder %s775_s23, %s825_s3 }
 0x151   : > { %p617_p11 = scmp.lt.u32.totalorder %s615_s6, %s611_s30  ;;  %p619_p13 = scmp.lt.u32.totalorder %s611_s30, %s775_s23 }
 0x152   : > { %p613_p7 = pnand %p612_p6, %p741_p4 }
 0x153   : > { %p618_p12 = por %p617_p11, %p616_p10 }
 0x154   : > { %p614_p9 = pneg %p613_p7 }
 0x155   : > { %p620_p0 = por %p619_p13, %p618_p12 }
 0x157   : > { %p621_p1 = pnand %p620_p0, %p614_p9 }
 0x159   : > { %624 = shalt.err (!%p621_p1)
}
 0x15a   : > { %528 = dma.vmem_to_hbm [thread:$0]  (%p741_p4), %s777_s18, 128, %s775_s23, %s360_s26  }
 0x15b PF: > { %p534_p2 = scmp.ge.s32.totalorder %s675_s17, 2  ;;  %s387_s9 = sand.u32 1, %s655_s12  }
 0x15c   : > { %s388_s10 = scalar_lea.sflag [#allocation3], %s387_s9 }
 0x15d   : > { %p531_p3 = pnand %p534_p2, %p748_p8 }
 0x15f   : > { %650 = dma.done.wait (!%p531_p3), %s388_s10, 128  }
 0x160   : > { %652 = vsyncadd (!%p531_p3), %s388_s10, 4294967168  ;;  %s16_s17 = sadd.s32 1, %s675_s17   ;;  %s828_s12 = smov %s659_s13 }
 0x161   : > { %p13_p5 = scmp.ge.s32.totalorder %s16_s17, 5   ;;  %s829_s13 = smov %s663_s14 }
 0x162   : > { %s830_s14 = smov %s754_s25  ;;  %s831_s15 = smov %s671_s16 }
 0x163   : > { %s832_s16 = smov %s834_s20  ;;  %15 = sbr.rel (!%p13_p5) target bundleno = 4 (0x4), region = 73 }
 0x16a   :  { %393 = vsyncpa [#allocation3], 1 }
 0x16b   :  { %395 = vsyncpa [#allocation3 + $0x1], 1 }

</bundles_post_ra>
